<compile_context>
chip_gen: v5e
topology: v5e:2x2
jax: 0.10.0
libtpu: 0.0.40
codegen_flags: <defaults>
</compile_context>

<pallas_src>
import functools

import jax
import jax.numpy as jnp
from jax.experimental import pallas as pl
from jax.experimental.pallas import tpu as pltpu


def _round_up(n, m):
    return ((n + m - 1) // m) * m


def _nnet_kernel(p_ref, xt_ref, o_ref):
    # p_ref: (9,) f32 in SMEM:
    #   [w1_00, w1_01, w1_10, w1_11, b1_0, b1_1, w2_00, w2_10, b2_0]
    #   (w1, w2 stored as (in, out) row-major — i.e. PyTorch W.T)
    # xt_ref: (2, T) f32, batch on the lane axis.   o_ref: (1, T) f32.
    x0 = xt_ref[0:1, :]                         # (1, T)
    x1 = xt_ref[1:2, :]                         # (1, T)

    # Layer 1: Linear(2, 2) + Sigmoid, unrolled as scalar-splat FMAs (VPU only).
    h0 = jax.nn.sigmoid(x0 * p_ref[0] + x1 * p_ref[2] + p_ref[4])
    h1 = jax.nn.sigmoid(x0 * p_ref[1] + x1 * p_ref[3] + p_ref[5])

    # Layer 2: Linear(2, 1) + Sigmoid.  Lane-dense (1, T) store (unmasked vst).
    o_ref[...] = jax.nn.sigmoid(h0 * p_ref[6] + h1 * p_ref[7] + p_ref[8])


@functools.partial(jax.jit, static_argnames=("lane_tile",))
def nnet_forward(x, w1, b1, w2, b2, *, lane_tile=512):
    """x: (B, 2). w1: (2, 2) as (in, out). b1: (2,). w2: (2, 1) as (in, out). b2: (1,)."""
    B = x.shape[0]
    if x.dtype != jnp.float32:
        x = x.astype(jnp.float32)               # mirrors x.float() in PyTorch

    # Lane tile: multiple of 128, up to `lane_tile` (512 default — ~85% of HBM
    # roofline per measured tiled data); pad batch tail with zeros.
    tile = min(lane_tile, _round_up(max(B, 1), 128))
    Bp = _round_up(B, tile)

    # (B, 2) -> lane-dense (2, Bp); features on the sublane axis, batch on lanes.
    xt = jnp.zeros((2, Bp), jnp.float32).at[:, :B].set(x.T)

    # Pack the 9 parameters into one SMEM-resident scalar array.
    params = jnp.concatenate([
        w1.reshape(-1).astype(jnp.float32),     # (4,) w1 row-major (in, out)
        b1.reshape(-1).astype(jnp.float32),     # (2,)
        w2.reshape(-1).astype(jnp.float32),     # (2,) w2 (in, out)
        b2.reshape(-1).astype(jnp.float32),     # (1,)
    ])

    out_t = pl.pallas_call(
        _nnet_kernel,
        out_shape=jax.ShapeDtypeStruct((1, Bp), jnp.float32),
        grid=(Bp // tile,),
        in_specs=[
            pl.BlockSpec(memory_space=pltpu.SMEM),        # params: scalars in SMEM
            pl.BlockSpec((2, tile), lambda i: (0, i)),    # x tile, lane-dense
        ],
        out_specs=pl.BlockSpec((1, tile), lambda i: (0, i)),
        compiler_params=pltpu.CompilerParams(
            dimension_semantics=("parallel",)),
    )(params, xt)

    # Back to the PyTorch (B, 1) convention; drop the padded batch tail.
    return out_t[0, :B].reshape(B, 1)


def nnet_reference(x, w1, b1, w2, b2):
    h = jax.nn.sigmoid(x.astype(jnp.float32) @ w1 + b1)
    return jax.nn.sigmoid(h @ w2 + b2)


if __name__ == "__main__":
    key = jax.random.PRNGKey(0)
    kx, k1, k2, k3, k4 = jax.random.split(key, 5)

    B = 8  # small batch (e.g. the 4 XOR points repeated twice)
    x = jax.random.normal(kx, (B, 2), dtype=jnp.float32)

    # Deterministic init, akin to PyTorch's default Linear init.
    # Stored as (in_features, out_features) — i.e. PyTorch W.T — so the math is
    # y = x @ W_pt.T + b, identical to nn.Linear.
    bound = 1.0 / jnp.sqrt(2.0)
    w1 = jax.random.uniform(k1, (2, 2), jnp.float32, -bound, bound)
    b1 = jax.random.uniform(k2, (2,), jnp.float32, -bound, bound)
    w2 = jax.random.uniform(k3, (2, 1), jnp.float32, -bound, bound)
    b2 = jax.random.uniform(k4, (1,), jnp.float32, -bound, bound)

    out = jax.block_until_ready(nnet_forward(x, w1, b1, w2, b2))
    ref = nnet_reference(x, w1, b1, w2, b2)

    assert out.shape == (B, 1), out.shape
    assert jnp.allclose(out, ref, atol=1e-5, rtol=1e-5), (out, ref)

    print("KERNEL_OK")
</pallas_src>

<mosaic_0001>
module attributes {stable_mosaic.version = 11 : i64} {
  func.func @_nnet_kernel(%arg0: i32, %arg1: memref<9xf32, #tpu.memory_space<smem>>, %arg2: memref<2x128xf32, #tpu.memory_space<vmem>>, %arg3: memref<1x128xf32, #tpu.memory_space<vmem>>) attributes {dimension_semantics = [#tpu.dimension_semantics<parallel>], iteration_bounds = array<i64: 1>, scalar_prefetch = 0 : i64, scratch_operands = 0 : i64, tpu.core_type = #tpu.core_type<tc>, window_params = [{transform_indices = @transform_0, window_bounds = array<i64: 9>}, {transform_indices = @transform_1, window_bounds = array<i64: 2, 128>}, {transform_indices = @transform_2, window_bounds = array<i64: 1, 128>}]} {
    %c0 = arith.constant 0 : index
    %c0_0 = arith.constant 0 : index
    %0 = vector.load %arg2[%c0, %c0_0] : memref<2x128xf32, #tpu.memory_space<vmem>>, vector<1x128xf32>
    %c1 = arith.constant 1 : index
    %c0_1 = arith.constant 0 : index
    %1 = vector.load %arg2[%c1, %c0_1] : memref<2x128xf32, #tpu.memory_space<vmem>>, vector<1x128xf32>
    %c0_2 = arith.constant 0 : index
    %2 = memref.load %arg1[%c0_2] : memref<9xf32, #tpu.memory_space<smem>>
    %3 = vector.broadcast %2 : f32 to vector<1x128xf32>
    %4 = arith.mulf %0, %3 : vector<1x128xf32>
    %c2 = arith.constant 2 : index
    %5 = memref.load %arg1[%c2] : memref<9xf32, #tpu.memory_space<smem>>
    %6 = vector.broadcast %5 : f32 to vector<1x128xf32>
    %7 = arith.mulf %1, %6 : vector<1x128xf32>
    %8 = arith.addf %4, %7 : vector<1x128xf32>
    %c4 = arith.constant 4 : index
    %9 = memref.load %arg1[%c4] : memref<9xf32, #tpu.memory_space<smem>>
    %10 = vector.broadcast %9 : f32 to vector<1x128xf32>
    %11 = arith.addf %8, %10 : vector<1x128xf32>
    %12 = arith.negf %11 : vector<1x128xf32>
    %13 = math.exp %12 : vector<1x128xf32>
    %cst = arith.constant 1.000000e+00 : f32
    %14 = vector.broadcast %cst : f32 to vector<1x128xf32>
    %15 = arith.addf %14, %13 : vector<1x128xf32>
    %16 = arith.divf %14, %15 : vector<1x128xf32>
    %c1_3 = arith.constant 1 : index
    %17 = memref.load %arg1[%c1_3] : memref<9xf32, #tpu.memory_space<smem>>
    %18 = vector.broadcast %17 : f32 to vector<1x128xf32>
    %19 = arith.mulf %0, %18 : vector<1x128xf32>
    %c3 = arith.constant 3 : index
    %20 = memref.load %arg1[%c3] : memref<9xf32, #tpu.memory_space<smem>>
    %21 = vector.broadcast %20 : f32 to vector<1x128xf32>
    %22 = arith.mulf %1, %21 : vector<1x128xf32>
    %23 = arith.addf %19, %22 : vector<1x128xf32>
    %c5 = arith.constant 5 : index
    %24 = memref.load %arg1[%c5] : memref<9xf32, #tpu.memory_space<smem>>
    %25 = vector.broadcast %24 : f32 to vector<1x128xf32>
    %26 = arith.addf %23, %25 : vector<1x128xf32>
    %27 = arith.negf %26 : vector<1x128xf32>
    %28 = math.exp %27 : vector<1x128xf32>
    %cst_4 = arith.constant 1.000000e+00 : f32
    %29 = vector.broadcast %cst_4 : f32 to vector<1x128xf32>
    %30 = arith.addf %29, %28 : vector<1x128xf32>
    %31 = arith.divf %29, %30 : vector<1x128xf32>
    %c6 = arith.constant 6 : index
    %32 = memref.load %arg1[%c6] : memref<9xf32, #tpu.memory_space<smem>>
    %33 = vector.broadcast %32 : f32 to vector<1x128xf32>
    %34 = arith.mulf %16, %33 : vector<1x128xf32>
    %c7 = arith.constant 7 : index
    %35 = memref.load %arg1[%c7] : memref<9xf32, #tpu.memory_space<smem>>
    %36 = vector.broadcast %35 : f32 to vector<1x128xf32>
    %37 = arith.mulf %31, %36 : vector<1x128xf32>
    %38 = arith.addf %34, %37 : vector<1x128xf32>
    %c8 = arith.constant 8 : index
    %39 = memref.load %arg1[%c8] : memref<9xf32, #tpu.memory_space<smem>>
    %40 = vector.broadcast %39 : f32 to vector<1x128xf32>
    %41 = arith.addf %38, %40 : vector<1x128xf32>
    %42 = arith.negf %41 : vector<1x128xf32>
    %43 = math.exp %42 : vector<1x128xf32>
    %cst_5 = arith.constant 1.000000e+00 : f32
    %44 = vector.broadcast %cst_5 : f32 to vector<1x128xf32>
    %45 = arith.addf %44, %43 : vector<1x128xf32>
    %46 = arith.divf %44, %45 : vector<1x128xf32>
    %c0_6 = arith.constant 0 : index
    %c0_7 = arith.constant 0 : index
    %47 = vector.load %arg3[%c0_6, %c0_7] : memref<1x128xf32, #tpu.memory_space<vmem>>, vector<1x128xf32>
    tpu.vector_store %arg3[%c0_6, %c0_7], %46 {strides = array<i32>} : memref<1x128xf32, #tpu.memory_space<vmem>>, vector<1x128xf32>,
    return
  }
  func.func @transform_0(%arg0: i32) -> i32 {
    %c0_i32 = arith.constant 0 : i32
    %c0_i32_0 = arith.constant 0 : i32
    return %c0_i32 : i32
  }
  func.func @transform_1(%arg0: i32) -> (i32, i32) {
    %c0_i32 = arith.constant 0 : i32
    %c0_i32_0 = arith.constant 0 : i32
    return %c0_i32, %arg0 : i32, i32
  }
  func.func @transform_2(%arg0: i32) -> (i32, i32) {
    %c0_i32 = arith.constant 0 : i32
    %c0_i32_0 = arith.constant 0 : i32
    return %c0_i32, %arg0 : i32, i32
  }
}

</mosaic_0001>

<bundles_post_ra>
// kernel: nnet_forward.1
= control target key start
LH: loop header
LB: loop body
LE: loop exit
PB: predicated region body
PF: predicated region fallthrough
CT: control target
= control target key end

     0   :  { %7 = vsyncpa [#allocation3], 0  ;;  %s157_s12 = smov [#allocation2]   ;;  %s185_s0 = inlined_call_operand.vmem [shape: f32[9], index: 0, kind: input, shape index: {}]   ;;  %s186_s1 = inlined_call_operand.vmem [shape: f32[2,128], index: 1, kind: input, shape index: {}]   ;;  %s187_s2 = inlined_call_operand.vmem [shape: f32[1,128], index: 2, kind: output, shape index: {}]  }
   0x1   :  { %s13_s11 = sshll.u32 %s185_s0, 4  ;;  %s14_s11 = int_to_ptr.vmem [resolvable:$true] %s13_s11 }
   0x2   :  { %16 = dma.vmem_to_smem %s14_s11, 16, %s157_s12, [#allocation3]  }
   0x3   :  { %155 = dma.done.wait [#allocation3], 16  }
   0x4   :  { %156 = vsyncadd [#allocation3], 4294967280 }
   0x5   :  { %23 = sfence }
   0x6   :  { %s26_s13 = sld [smem:[#allocation2]]  ;;  %v24_v0 = vld [vmem:[%s186_s1] sm:$0x1]  ;;  %v25_v1 = vld [vmem:[%s186_s1 + $0x1] sm:$0x1] }
   0x7   :  { %s119_s14 = sld [smem:[#allocation2 + $0x2]] }
   0x8   :  { %s120_s15 = sld [smem:[#allocation2 + $0x4]] }
   0x9   :  { %s122_s16 = sld [smem:[#allocation2 + $0x1]] }
   0xa   :  { %s123_s19 = sld [smem:[#allocation2 + $0x3]] }
   0xb   :  { %s124_s0 = sld [smem:[#allocation2 + $0x5]] }
   0xc   :  { %v27_v2 = vstv %s26_s13  ;;  %s126_s1 = sld [smem:[#allocation2 + $0x6]] }
   0xd   :  { %v28_v3 = vmul.f32 %v27_v2, %v24_v0  ;;  %v30_v4 = vstv %s119_s14  ;;  %s127_s22 = sld [smem:[#allocation2 + $0x7]] }
   0xe   :  { %v31_v5 = vmul.f32 %v30_v4, %v25_v1  ;;  %v34_v6 = vstv %s120_s15  ;;  %s128_s23 = sld [smem:[#allocation2 + $0x8]] }
   0xf   :  { %v56_v7 = vstv %s122_s16 }
  0x10   :  { %v32_v8 = vadd.f32 %v31_v5, %v28_v3  ;;  %v57_v9 = vmul.f32 %v56_v7, %v24_v0  ;;  %v59_v10 = vstv %s123_s19 }
  0x11   :  { %v60_v11 = vmul.f32 %v59_v10, %v25_v1  ;;  %v63_v13 = vstv %s124_s0 }
  0x12   :  { %v35_v12 = vadd.f32 %v34_v6, %v32_v8  ;;  %v85_v38 = vstv %s126_s1 }
  0x13   :  { %v61_v14 = vadd.f32 %v60_v11, %v57_v9  ;;  %v88_v41 = vstv %s127_s22 }
  0x14   :  { %v121_v15 = vmul.f32 -1.442695, %v35_v12  ;;  %v92_v46 = vstv %s128_s23 }
  0x15   :  { %v64_v16 = vadd.f32 %v63_v13, %v61_v14 }
  0x16   :  { %131 = vpow2.f32 %v121_v15 }
  0x17   :  { %v125_v17 = vmul.f32 -1.442695, %v64_v16 }
  0x19   :  { %133 = vpow2.f32 %v125_v17 }
  0x1c   :  { %v132_v18 = vpop.eup %131 }
  0x1d   :  { %v39_v19 = vadd.f32 1.0, %v132_v18 }
  0x1f   :  { %v134_v20 = vpop.eup %133  ;;  %135 = vrcp.f32 %v39_v19  ;;  %v51_v24 = vand.u32 2147483648, %v39_v19  ;;  %vm45_vm0 = vweird.f32 %v39_v19  ;;  %v49_v27 = vand.u32 2147483647, %v39_v19 }
  0x20   :  { %v68_v21 = vadd.f32 1.0, %v134_v20 }
  0x21   :  { %v52_v30 = vor.u32 1.1754944e-38, %v51_v24  ;;  %vm50_vm5 = vcmp.eq.f32.partialorder %v49_v27, 8.507059e+37 }
  0x22   :  { %137 = vrcp.f32 %v68_v21  ;;  %v80_v31 = vand.u32 2147483648, %v68_v21  ;;  %vm74_vm3 = vweird.f32 %v68_v21  ;;  %v78_v33 = vand.u32 2147483647, %v68_v21 }
  0x24   :  { %v81_v37 = vor.u32 1.1754944e-38, %v80_v31  ;;  %vm79_vm7 = vcmp.eq.f32.partialorder %v78_v33, 8.507059e+37 }
  0x25   :  { %v136_v22 = vpop.eup %135 }
  0x26   :  { %v41_v23 = vmul.f32 %v136_v22, %v39_v19  ;;  %vm46_vm1 = vweird.f32 %v136_v22 }
  0x27   :  { %vm47_vm2 = vmor %vm45_vm0, %vm46_vm1 }
  0x28   :  { %v138_v25 = vpop.eup %137  ;;  %v42_v26 = vsub.f32 1.0, %v41_v23 }
  0x29   :  { %v70_v28 = vmul.f32 %v138_v25, %v68_v21  ;;  %vm75_vm4 = vweird.f32 %v138_v25 }
  0x2a   :  { %v43_v29 = vmul.f32 %v136_v22, %v42_v26  ;;  %vm76_vm6 = vmor %vm74_vm3, %vm75_vm4 }
  0x2b   :  { %v71_v32 = vsub.f32 1.0, %v70_v28 }
  0x2c   :  { %v44_v34 = vadd.f32 %v136_v22, %v43_v29 }
  0x2d   :  { %v72_v35 = vmul.f32 %v138_v25, %v71_v32 }
  0x2e   :  { %v48_v36 = vsel %vm47_vm2, %v136_v22, %v44_v34 }
  0x2f   :  { %v53_v39 = vsel %vm50_vm5, %v52_v30, %v48_v36  ;;  %v73_v40 = vadd.f32 %v138_v25, %v72_v35 }
  0x30   :  { %v86_v43 = vmul.f32 %v85_v38, %v53_v39 }
  0x31   :  { %v77_v42 = vsel %vm76_vm6, %v138_v25, %v73_v40 }
  0x32   :  { %v82_v44 = vsel %vm79_vm7, %v81_v37, %v77_v42 }
  0x33   :  { %v89_v45 = vmul.f32 %v88_v41, %v82_v44 }
  0x35   :  { %v90_v47 = vadd.f32 %v89_v45, %v86_v43 }
  0x37   :  { %v93_v48 = vadd.f32 %v92_v46, %v90_v47 }
  0x39   :  { %v129_v49 = vmul.f32 -1.442695, %v93_v48 }
  0x3b   :  { %139 = vpow2.f32 %v129_v49 }
  0x41   :  { %v140_v50 = vpop.eup %139 }
  0x42   :  { %v97_v51 = vadd.f32 1.0, %v140_v50 }
  0x44   :  { %141 = vrcp.f32 %v97_v51  ;;  %v109_v54 = vand.u32 2147483648, %v97_v51  ;;  %vm103_vm8 = vweird.f32 %v97_v51  ;;  %v107_v56 = vand.u32 2147483647, %v97_v51 }
  0x46   :  { %v110_v58 = vor.u32 1.1754944e-38, %v109_v54  ;;  %vm108_vm11 = vcmp.eq.f32.partialorder %v107_v56, 8.507059e+37 }
  0x4a   :  { %v142_v52 = vpop.eup %141 }
  0x4b   :  { %v99_v53 = vmul.f32 %v142_v52, %v97_v51  ;;  %vm104_vm9 = vweird.f32 %v142_v52 }
  0x4c   :  { %vm105_vm10 = vmor %vm103_vm8, %vm104_vm9 }
  0x4d   :  { %v100_v55 = vsub.f32 1.0, %v99_v53 }
  0x4f   :  { %v101_v57 = vmul.f32 %v142_v52, %v100_v55 }
  0x51   :  { %v102_v59 = vadd.f32 %v142_v52, %v101_v57 }
  0x53   :  { %v106_v60 = vsel %vm105_vm10, %v142_v52, %v102_v59 }
  0x54   :  { %v111_v61 = vsel %vm108_vm11, %v110_v58, %v106_v60 }
  0x55   :  { %113 = vst [vmem:[%s187_s2] sm:$0x1] %v111_v61 }
  0x56   :  { %118 = vsyncpa [#allocation3], 1 }

</bundles_post_ra>
